<compile_context>
chip_gen: v7x
topology: tpu7x:2x2x1
jax: 0.10.0
libtpu: 0.0.40
codegen_flags: <defaults>
</compile_context>

<pallas_src>
import functools
import numpy as np
import jax
import jax.numpy as jnp
from jax import lax
from jax.experimental import pallas as pl
from jax.experimental.pallas import tpu as pltpu


def _sobel_ca_kernel(x_ref, sx_ref, bx_ref, sy_ref, by_ref, o_ref, *,
                     C, P, S, E):
    """Fused sobel-x/sobel-y conv + folded BN + magnitude for one image.

    x_ref : (C, L) VMEM  -- flat zero-padded image per channel, L = P + 2*E.
                            Flat index p = i*S + j over the (H+2, W+2) padded
                            grid (S = W+2); an extra E = S+1 zero margin at
                            both ends makes every 3x3 tap a contiguous
                            lane slice of length P.
    sx/bx, sy/by : (O, 1) VMEM -- folded BatchNorm scale / shift per channel.
    o_ref : (O, P) VMEM  -- magnitude over the padded grid; the pad ring is
                            stripped by the wrapper.
    """
    X = x_ref[...]                                  # (C, L)

    # Channel sum: every output channel uses the same filter replicated over
    # input channels, so conv(x) == filter * sum_c(x_c).
    s = X[0:1, :]
    for c in range(1, C):
        s = s + X[c:c + 1, :]                       # (1, L)

    def tap(ky, kx):
        off = (ky - 1) * S + (kx - 1)
        return s[:, E + off:E + off + P]            # (1, P) contiguous slice

    p00, p01, p02 = tap(0, 0), tap(0, 1), tap(0, 2)
    p10, p12 = tap(1, 0), tap(1, 2)
    p20, p21, p22 = tap(2, 0), tap(2, 1), tap(2, 2)

    # Constant-folded sobel taps (zero taps skipped; x2 done as add).
    tx = p10 - p12
    gx = (p00 - p02) + (p20 - p22) + (tx + tx)      # filter_x = [[1,0,-1],[2,0,-2],[1,0,-1]]
    ty = p01 - p21
    gy = (p00 + p02) - (p20 + p22) + (ty + ty)      # filter_y = [[1,2,1],[0,0,0],[-1,-2,-1]]

    # Per-output-channel folded-BN affine + magnitude, all O channels at once.
    gxs = gx * sx_ref[...] + bx_ref[...]            # (1,P)*(O,1)+(O,1) -> (O, P)
    gys = gy * sy_ref[...] + by_ref[...]
    o_ref[...] = jnp.sqrt(gxs * gxs + gys * gys + 1e-6)


def _run_sobel_pallas(x, scale_x, shift_x, scale_y, shift_y):
    """Equivalent of run_sobel(conv_x, conv_y, x) with BN folded to affine."""
    N, C, H, W = x.shape
    O = scale_x.shape[0]
    S, Hp = W + 2, H + 2
    P = Hp * S
    E = S + 1
    L = P + 2 * E

    # Zero-pad spatially, flatten, and add an E-element zero margin at both
    # ends of the flat axis (XLA side, tiny).
    xf = jnp.pad(x, ((0, 0), (0, 0), (1, 1), (1, 1))).reshape(N, C, P)
    xf = jnp.pad(xf, ((0, 0), (0, 0), (E, E)))

    kernel = functools.partial(_sobel_ca_kernel, C=C, P=P, S=S, E=E)
    col = lambda v: v.reshape(O, 1).astype(jnp.float32)

    out_flat = pl.pallas_call(
        kernel,
        out_shape=jax.ShapeDtypeStruct((N, O, P), jnp.float32),
        grid=(N,),
        in_specs=[
            pl.BlockSpec((None, C, L), lambda n: (n, 0, 0)),
            pl.BlockSpec((O, 1), lambda n: (0, 0)),
            pl.BlockSpec((O, 1), lambda n: (0, 0)),
            pl.BlockSpec((O, 1), lambda n: (0, 0)),
            pl.BlockSpec((O, 1), lambda n: (0, 0)),
        ],
        out_specs=pl.BlockSpec((None, O, P), lambda n: (n, 0, 0)),
        compiler_params=pltpu.CompilerParams(
            dimension_semantics=("parallel",)),
    )(xf, col(scale_x), col(shift_x), col(scale_y), col(shift_y))

    # Strip the pad ring and restore NCHW.
    return out_flat.reshape(N, O, Hp, S)[:, :, 1:H + 1, 1:W + 1]


run_sobel_pallas = jax.jit(_run_sobel_pallas)


def run_sobel_ref(x, wx, wy, scale_x, shift_x, scale_y, shift_y):
    """Pure-JAX reference for correctness checking."""
    dn = ('NCHW', 'OIHW', 'NCHW')
    gx = lax.conv_general_dilated(x, wx, (1, 1), ((1, 1), (1, 1)),
                                  dimension_numbers=dn)
    gy = lax.conv_general_dilated(x, wy, (1, 1), ((1, 1), (1, 1)),
                                  dimension_numbers=dn)
    gx = gx * scale_x[None, :, None, None] + shift_x[None, :, None, None]
    gy = gy * scale_y[None, :, None, None] + shift_y[None, :, None, None]
    return jnp.sqrt(gx * gx + gy * gy + 1e-6)


class CAPallas:
    """JAX/Pallas port of the PyTorch `CA` module."""

    def __init__(self, inc, outc, key):
        # Fixed (non-learnable) sobel filters, repeated over in/out channels,
        # exactly as in get_sobel(): weight shape (outc, inc, 3, 3).
        # NOTE: the Pallas kernel constant-folds these filters and shares the
        # conv response across output channels; this is valid precisely
        # because get_sobel tiles the SAME filter over (outc, inc) and marks
        # it non-learnable.  (Kept here only for the pure-JAX reference.)
        fx = np.array([[1, 0, -1], [2, 0, -2], [1, 0, -1]], np.float32)
        fy = np.array([[1, 2, 1], [0, 0, 0], [-1, -2, -1]], np.float32)
        self.wx = jnp.asarray(np.tile(fx[None, None], (outc, inc, 1, 1)))
        self.wy = jnp.asarray(np.tile(fy[None, None], (outc, inc, 1, 1)))

        # Deterministic BatchNorm parameters, folded into per-channel affine.
        # TODO(synk): BatchNorm is applied in inference mode (running stats);
        # PyTorch's default train-mode batch statistics are not modeled.
        ks = jax.random.split(key, 8)
        eps = 1e-5

        def bn_params(k0, k1, k2, k3):
            gamma = 1.0 + 0.1 * jax.random.normal(k0, (outc,), jnp.float32)
            beta = 0.1 * jax.random.normal(k1, (outc,), jnp.float32)
            mean = 0.1 * jax.random.normal(k2, (outc,), jnp.float32)
            var = 1.0 + 0.5 * jax.random.uniform(k3, (outc,), jnp.float32)
            scale = gamma / jnp.sqrt(var + eps)
            shift = beta - mean * scale
            return scale, shift

        self.scale_x, self.shift_x = bn_params(*ks[0:4])
        self.scale_y, self.shift_y = bn_params(*ks[4:8])

    def __call__(self, boundary_16, boundary_8, boundary_4, boundary):
        # Output order matches the PyTorch forward:
        # (label_extract, label_extract_16, label_extract_8, label_extract_4)
        inputs = [boundary, boundary_16, boundary_8, boundary_4]

        # Fuse launches: group same-shape inputs, concat along N, run once per
        # group (2 pallas_calls for the 4 module inputs), then split back.
        groups = {}
        for i, xi in enumerate(inputs):
            groups.setdefault(tuple(xi.shape), []).append(i)

        results = [None] * len(inputs)
        for _, idxs in groups.items():
            xs = [inputs[i] for i in idxs]
            x = jnp.concatenate(xs, axis=0) if len(xs) > 1 else xs[0]
            out = run_sobel_pallas(x, self.scale_x, self.shift_x,
                                   self.scale_y, self.shift_y)
            off = 0
            for i in idxs:
                n = inputs[i].shape[0]
                results[i] = out[off:off + n]
                off += n
        return tuple(results)

    def reference(self, boundary_16, boundary_8, boundary_4, boundary):
        run = lambda x: run_sobel_ref(
            x, self.wx, self.wy,
            self.scale_x, self.shift_x, self.scale_y, self.shift_y)
        return run(boundary), run(boundary_16), run(boundary_8), run(boundary_4)


if __name__ == "__main__":
    inc, outc = 4, 4
    keys = jax.random.split(jax.random.PRNGKey(0), 5)
    ca = CAPallas(inc, outc, keys[0])

    boundary = jax.random.normal(keys[1], (2, inc, 16, 16), jnp.float32)
    boundary_16 = jax.random.normal(keys[2], (2, inc, 8, 8), jnp.float32)
    boundary_8 = jax.random.normal(keys[3], (2, inc, 8, 8), jnp.float32)
    boundary_4 = jax.random.normal(keys[4], (2, inc, 16, 16), jnp.float32)

    outs = ca(boundary_16, boundary_8, boundary_4, boundary)
    outs = jax.block_until_ready(outs)

    refs = ca.reference(boundary_16, boundary_8, boundary_4, boundary)
    for o, r in zip(outs, refs):
        np.testing.assert_allclose(np.asarray(o), np.asarray(r),
                                   rtol=1e-4, atol=1e-4)

    print("KERNEL_OK")
</pallas_src>

<mosaic_0001>
module attributes {stable_mosaic.version = 11 : i64} {
  func.func @_sobel_ca_kernel(%arg0: i32, %arg1: memref<1x4x362xf32, #tpu.memory_space<vmem>>, %arg2: memref<4x1xf32, #tpu.memory_space<vmem>>, %arg3: memref<4x1xf32, #tpu.memory_space<vmem>>, %arg4: memref<4x1xf32, #tpu.memory_space<vmem>>, %arg5: memref<4x1xf32, #tpu.memory_space<vmem>>, %arg6: memref<1x4x324xf32, #tpu.memory_space<vmem>>) attributes {dimension_semantics = [#tpu.dimension_semantics<parallel>], iteration_bounds = array<i64: 4>, scalar_prefetch = 0 : i64, scratch_operands = 0 : i64, tpu.core_type = #tpu.core_type<tc>, window_params = [{transform_indices = @transform_0, window_bounds = array<i64: 1, 4, 362>}, {pipeline_mode = #tpu.pipeline_mode<synchronous>, transform_indices = @transform_1, window_bounds = array<i64: 4, 1>}, {pipeline_mode = #tpu.pipeline_mode<synchronous>, transform_indices = @transform_2, window_bounds = array<i64: 4, 1>}, {pipeline_mode = #tpu.pipeline_mode<synchronous>, transform_indices = @transform_3, window_bounds = array<i64: 4, 1>}, {pipeline_mode = #tpu.pipeline_mode<synchronous>, transform_indices = @transform_4, window_bounds = array<i64: 4, 1>}, {transform_indices = @transform_5, window_bounds = array<i64: 1, 4, 324>}]} {
    %c0 = arith.constant 0 : index
    %c0_0 = arith.constant 0 : index
    %c0_1 = arith.constant 0 : index
    %0 = vector.load %arg1[%c0, %c0_0, %c0_1] : memref<1x4x362xf32, #tpu.memory_space<vmem>>, vector<1x4x362xf32>
    %1 = vector.shape_cast %0 : vector<1x4x362xf32> to vector<4x362xf32>
    %2 = vector.extract_strided_slice %1 {offsets = [0, 0], sizes = [1, 362], strides = [1, 1]} : vector<4x362xf32> to vector<1x362xf32>
    %3 = vector.extract_strided_slice %1 {offsets = [1, 0], sizes = [1, 362], strides = [1, 1]} : vector<4x362xf32> to vector<1x362xf32>
    %4 = arith.addf %2, %3 : vector<1x362xf32>
    %5 = vector.extract_strided_slice %1 {offsets = [2, 0], sizes = [1, 362], strides = [1, 1]} : vector<4x362xf32> to vector<1x362xf32>
    %6 = arith.addf %4, %5 : vector<1x362xf32>
    %7 = vector.extract_strided_slice %1 {offsets = [3, 0], sizes = [1, 362], strides = [1, 1]} : vector<4x362xf32> to vector<1x362xf32>
    %8 = arith.addf %6, %7 : vector<1x362xf32>
    %9 = vector.extract_strided_slice %8 {offsets = [0, 0], sizes = [1, 324], strides = [1, 1]} : vector<1x362xf32> to vector<1x324xf32>
    %10 = vector.extract_strided_slice %8 {offsets = [0, 1], sizes = [1, 324], strides = [1, 1]} : vector<1x362xf32> to vector<1x324xf32>
    %11 = vector.extract_strided_slice %8 {offsets = [0, 2], sizes = [1, 324], strides = [1, 1]} : vector<1x362xf32> to vector<1x324xf32>
    %12 = vector.extract_strided_slice %8 {offsets = [0, 18], sizes = [1, 324], strides = [1, 1]} : vector<1x362xf32> to vector<1x324xf32>
    %13 = vector.extract_strided_slice %8 {offsets = [0, 20], sizes = [1, 324], strides = [1, 1]} : vector<1x362xf32> to vector<1x324xf32>
    %14 = vector.extract_strided_slice %8 {offsets = [0, 36], sizes = [1, 324], strides = [1, 1]} : vector<1x362xf32> to vector<1x324xf32>
    %15 = vector.extract_strided_slice %8 {offsets = [0, 37], sizes = [1, 324], strides = [1, 1]} : vector<1x362xf32> to vector<1x324xf32>
    %16 = vector.extract_strided_slice %8 {offsets = [0, 38], sizes = [1, 324], strides = [1, 1]} : vector<1x362xf32> to vector<1x324xf32>
    %17 = arith.subf %12, %13 : vector<1x324xf32>
    %18 = arith.subf %9, %11 : vector<1x324xf32>
    %19 = arith.subf %14, %16 : vector<1x324xf32>
    %20 = arith.addf %18, %19 : vector<1x324xf32>
    %21 = arith.addf %17, %17 : vector<1x324xf32>
    %22 = arith.addf %20, %21 : vector<1x324xf32>
    %23 = arith.subf %10, %15 : vector<1x324xf32>
    %24 = arith.addf %9, %11 : vector<1x324xf32>
    %25 = arith.addf %14, %16 : vector<1x324xf32>
    %26 = arith.subf %24, %25 : vector<1x324xf32>
    %27 = arith.addf %23, %23 : vector<1x324xf32>
    %28 = arith.addf %26, %27 : vector<1x324xf32>
    %c0_2 = arith.constant 0 : index
    %c0_3 = arith.constant 0 : index
    %29 = vector.load %arg2[%c0_2, %c0_3] : memref<4x1xf32, #tpu.memory_space<vmem>>, vector<4x1xf32>
    %30 = vector.broadcast %22 : vector<1x324xf32> to vector<4x324xf32>
    %31 = vector.broadcast %29 : vector<4x1xf32> to vector<4x324xf32>
    %32 = arith.mulf %30, %31 : vector<4x324xf32>
    %c0_4 = arith.constant 0 : index
    %c0_5 = arith.constant 0 : index
    %33 = vector.load %arg3[%c0_4, %c0_5] : memref<4x1xf32, #tpu.memory_space<vmem>>, vector<4x1xf32>
    %34 = vector.broadcast %33 : vector<4x1xf32> to vector<4x324xf32>
    %35 = arith.addf %32, %34 : vector<4x324xf32>
    %c0_6 = arith.constant 0 : index
    %c0_7 = arith.constant 0 : index
    %36 = vector.load %arg4[%c0_6, %c0_7] : memref<4x1xf32, #tpu.memory_space<vmem>>, vector<4x1xf32>
    %37 = vector.broadcast %28 : vector<1x324xf32> to vector<4x324xf32>
    %38 = vector.broadcast %36 : vector<4x1xf32> to vector<4x324xf32>
    %39 = arith.mulf %37, %38 : vector<4x324xf32>
    %c0_8 = arith.constant 0 : index
    %c0_9 = arith.constant 0 : index
    %40 = vector.load %arg5[%c0_8, %c0_9] : memref<4x1xf32, #tpu.memory_space<vmem>>, vector<4x1xf32>
    %41 = vector.broadcast %40 : vector<4x1xf32> to vector<4x324xf32>
    %42 = arith.addf %39, %41 : vector<4x324xf32>
    %43 = arith.mulf %35, %35 : vector<4x324xf32>
    %44 = arith.mulf %42, %42 : vector<4x324xf32>
    %45 = arith.addf %43, %44 : vector<4x324xf32>
    %cst = arith.constant 9.99999997E-7 : f32
    %46 = vector.broadcast %cst : f32 to vector<4x324xf32>
    %47 = arith.addf %45, %46 : vector<4x324xf32>
    %48 = math.sqrt %47 : vector<4x324xf32>
    %c0_10 = arith.constant 0 : index
    %c0_11 = arith.constant 0 : index
    %c0_12 = arith.constant 0 : index
    %49 = vector.load %arg6[%c0_10, %c0_11, %c0_12] : memref<1x4x324xf32, #tpu.memory_space<vmem>>, vector<1x4x324xf32>
    %50 = vector.shape_cast %49 : vector<1x4x324xf32> to vector<4x324xf32>
    %51 = vector.shape_cast %48 : vector<4x324xf32> to vector<1x4x324xf32>
    tpu.vector_store %arg6[%c0_10, %c0_11, %c0_12], %51 {strides = array<i32>} : memref<1x4x324xf32, #tpu.memory_space<vmem>>, vector<1x4x324xf32>,
    return
  }
  func.func @transform_0(%arg0: i32) -> (i32, i32, i32) {
    %c0_i32 = arith.constant 0 : i32
    %c0_i32_0 = arith.constant 0 : i32
    %c0_i32_1 = arith.constant 0 : i32
    return %arg0, %c0_i32, %c0_i32_0 : i32, i32, i32
  }
  func.func @transform_1(%arg0: i32) -> (i32, i32) {
    %c0_i32 = arith.constant 0 : i32
    %c0_i32_0 = arith.constant 0 : i32
    %c0_i32_1 = arith.constant 0 : i32
    return %c0_i32, %c0_i32_0 : i32, i32
  }
  func.func @transform_2(%arg0: i32) -> (i32, i32) {
    %c0_i32 = arith.constant 0 : i32
    %c0_i32_0 = arith.constant 0 : i32
    %c0_i32_1 = arith.constant 0 : i32
    return %c0_i32, %c0_i32_0 : i32, i32
  }
  func.func @transform_3(%arg0: i32) -> (i32, i32) {
    %c0_i32 = arith.constant 0 : i32
    %c0_i32_0 = arith.constant 0 : i32
    %c0_i32_1 = arith.constant 0 : i32
    return %c0_i32, %c0_i32_0 : i32, i32
  }
  func.func @transform_4(%arg0: i32) -> (i32, i32) {
    %c0_i32 = arith.constant 0 : i32
    %c0_i32_0 = arith.constant 0 : i32
    %c0_i32_1 = arith.constant 0 : i32
    return %c0_i32, %c0_i32_0 : i32, i32
  }
  func.func @transform_5(%arg0: i32) -> (i32, i32, i32) {
    %c0_i32 = arith.constant 0 : i32
    %c0_i32_0 = arith.constant 0 : i32
    %c0_i32_1 = arith.constant 0 : i32
    return %arg0, %c0_i32, %c0_i32_0 : i32, i32, i32
  }
}

</mosaic_0001>

<bundles_post_ra>
// kernel: _run_sobel_pallas.1
= control target key start
LH: loop header
LB: loop body
LE: loop exit
PB: predicated region body
PF: predicated region fallthrough
CT: control target
= control target key end

     0   :  { %s615_s18 = smov 0   ;;  %s677_s0 = inlined_call_operand.vmem [shape: f32[4,4,362], index: 0, kind: input, shape index: {}]   ;;  %s678_s1 = inlined_call_operand.vmem [shape: f32[4,1], index: 1, kind: input, shape index: {}]   ;;  %s679_s2 = inlined_call_operand.vmem [shape: f32[4,1], index: 2, kind: input, shape index: {}]   ;;  %s680_s3 = inlined_call_operand.vmem [shape: f32[4,1], index: 3, kind: input, shape index: {}]   ;;  %s681_s4 = inlined_call_operand.vmem [shape: f32[4,1], index: 4, kind: input, shape index: {}]   ;;  %s682_s5 = inlined_call_operand.vmem [shape: f32[4,4,324], index: 5, kind: output, shape index: {}]  }
   0x1 LB: > { %s535_s19 = sadd.s32 4294967295, %s578_s18   ;;  %p539_p0 = scmp.ge.s32.totalorder %s578_s18, 1  ;;  %s578_s18 = sphi %s615_s18, %s15_s18  }
   0x2   : > { %p187_p1 = scmp.lt.s32.totalorder %s578_s18, 5 }
   0x4   : > { %p188_p2 = pnand %p539_p0, %p187_p1 }
   0x5   : > { %p215_p3 = scmp.lt.s32.totalorder (!%p188_p2), %s535_s19, 3  ;;  %s580_s24 = smov (!%p188_p2), 126   ;;  %v582_v14 = vmov (!%p188_p2), 0   ;;  %vm261_vm0 = vcmask (!%p188_p2), 1043456   ;;  %vm263_vm1 = vcmask (!%p188_p2), 1031168   ;;  %vm278_vm2 = vcmask (!%p188_p2), 752640  }
   0x6   : > { %191 = sbr.rel (%p188_p2) target bundleno = 326 (0x146), region = 40  ;;  %s581_s25 = smov (!%p188_p2), 92   ;;  %565 = vset.pattern.permute.xlu1 (!%p188_p2), %v582_v14  ;;  %564 = vset.pattern.permute.xlu0 (!%p188_p2), %v582_v14  ;;  %v393_v36 = vld [vmem:[%s680_s3] sm:$0xf] (!%p188_p2)  ;;  %v349_v51 = vlaneseq (!%p188_p2)  ;;  %vm295_vm3 = vcmask (!%p188_p2), 900096   ;;  %vm340_vm4 = vcmask (!%p188_p2), 1039360  }
   0x7   : > { %s583_s26 = smov (!%p188_p2), 110   ;;  %s584_s27 = smov (!%p188_p2), 127   ;;  %v384_v38 = vld [vmem:[%s679_s2] sm:$0xf] (!%p188_p2)  ;;  %vm478_vm5 = vcmask (!%p188_p2), 551936  }
   0x8   : > { %v346_v39 = vld [vmem:[%s678_s1] sm:$0xf] (!%p188_p2)  ;;  %v350_v62 = vshrl.u32 (!%p188_p2), %v349_v51, 7 }
   0x9   : > { %v431_v40 = vld [vmem:[%s681_s4] sm:$0xf] (!%p188_p2) }
   0xd   : > { %s684_s19 = smov (!%p215_p3, %s535_s19), 3 }
   0xe   : > { %s550_s20 = smul.u32 12, %s684_s19 }
  0x10   : > { %s219_s23 = scalar_lea.vmem %s677_s0, %s550_s20  ;;  %s224_s13 = scalar_lea.vmem %s682_s5, %s550_s20 }
  0x11   : > { %v225_v0 = vld [vmem:[%s219_s23] sm:$0xff]  ;;  %v226_v1 = vld [vmem:[%s219_s23 + $0x8] sm:$0xf] }
  0x12   : > { %v542_v2 = vrot.slane %v225_v0, 9  ;;  %v544_v3 = vrot.slane %v225_v0, 10  ;;  %v543_v4 = vrot.slane %v226_v1, 9  ;;  %v545_v5 = vrot.slane %v226_v1, 10 }
  0x13   : > { %v546_v7 = vrot.slane %v225_v0, 11  ;;  %v547_v11 = vrot.slane %v226_v1, 11 }
  0x14   : > { %v235_v6 = vadd.f32 %v542_v2, %v225_v0  ;;  %v236_v8 = vadd.f32 %v543_v4, %v226_v1  ;;  %v351_v4 = vsub.s32 0, %v350_v62 }
  0x16   : > { %v243_v9 = vadd.f32 %v544_v3, %v235_v6  ;;  %v244_v10 = vadd.f32 %v545_v5, %v236_v8  ;;  %v355_v8 = vsub.s32 4, %v350_v62 }
  0x18   : > { %v251_v12 = vadd.f32 %v546_v7, %v243_v9  ;;  %v252_v13 = vadd.f32 %v547_v11, %v244_v10 }
  0x1a   : > { %255 = vrot.lane.b32.xlu0 %v251_v12, %s580_s24  ;;  %301 = vrot.lane.b32.xlu1 %v251_v12, %s581_s25 }
  0x1e   : > { %257 = vrot.lane.b32.xlu0 %v252_v13, %s580_s24  ;;  %303 = vrot.lane.b32.xlu1 %v252_v13, %s581_s25 }
  0x8c   : > { %v256_v15 = vpop.permute.xlu0 %255  ;;  %v302_v16 = vpop.permute.xlu1 %301 }
  0x8d   : > { %v259_v19 = vrot.slane %v256_v15, 4  ;;  %v305_v22 = vrot.slane %v302_v16, 4 }
  0x90   : > { %v258_v17 = vpop.permute.xlu0 %257  ;;  %v304_v18 = vpop.permute.xlu1 %303 }
  0x91   : > { %v260_v20 = vrot.slane %v258_v17, 4  ;;  %v633_v21 = vsub.f32 %v252_v13, %v258_v17  ;;  %v306_v23 = vrot.slane %v304_v18, 4  ;;  %v638_v26 = vadd.f32 %v258_v17, %v252_v13 }
  0x92   : > { %v312_v29 = vsub.f32 %v252_v13, %v304_v18 }
  0x93   : > { %273 = vrot.lane.b32.xlu1 %v633_v21, %s581_s25  ;;  %v262_v24 = vsel %vm261_vm0, %v259_v19, %v260_v20  ;;  %v307_v28 = vsel %vm261_vm0, %v305_v22, %v306_v23  ;;  %v285_v30 = vadd.f32 %v633_v21, %v633_v21 }
  0x94   : > { %v264_v25 = vsel %vm263_vm1, %v256_v15, %v262_v24  ;;  %v308_v32 = vsel %vm278_vm2, %v302_v16, %v307_v28  ;;  %v330_v33 = vadd.f32 %v312_v29, %v312_v29 }
  0x95   : > { %v267_v27 = vsub.f32 %v251_v12, %v264_v25  ;;  %v313_v31 = vadd.f32 %v264_v25, %v251_v12  ;;  %v311_v35 = vsub.f32 %v251_v12, %v308_v32 }
  0x97   : > { %319 = vrot.lane.b32.xlu1 %v638_v26, %s581_s25  ;;  %271 = vrot.lane.b32.xlu0 %v267_v27, %s581_s25  ;;  %v284_v34 = vadd.f32 %v267_v27, %v267_v27  ;;  %v329_v37 = vadd.f32 %v311_v35, %v311_v35 }
  0x9b   : > { %290 = vrot.lane.b32.xlu1 %v285_v30, %s583_s26  ;;  %317 = vrot.lane.b32.xlu0 %v313_v31, %s581_s25 }
  0x9f   : > { %335 = vrot.lane.b32.xlu1 %v330_v33, %s584_s27  ;;  %288 = vrot.lane.b32.xlu0 %v284_v34, %s583_s26 }
  0xa3   : > { %425 = vperm.xlu1 %565, %v393_v36   ;;  %333 = vrot.lane.b32.xlu0 %v329_v37, %s584_s27 }
  0xa7   : > { %387 = vperm.xlu1 %565, %v384_v38   ;;  %378 = vperm.xlu0 %564, %v346_v39  }
  0xab   : > { %434 = vperm.xlu0 %564, %v431_v40  }
 0x105   : > { %v274_v41 = vpop.permute.xlu1 %273 }
 0x106   : > { %v276_v48 = vrot.slane %v274_v41, 4  ;;  %v283_v2 = vadd.f32 %v274_v41, %v633_v21 }
 0x109   : > { %v320_v42 = vpop.permute.xlu1 %319  ;;  %v272_v43 = vpop.permute.xlu0 %271 }
 0x10a   : > { %v275_v46 = vrot.slane %v272_v43, 4  ;;  %v322_v53 = vrot.slane %v320_v42, 4  ;;  %v328_v10 = vsub.f32 %v638_v26, %v320_v42 }
 0x10c   : > { %v277_v54 = vsel %vm261_vm0, %v275_v46, %v276_v48 }
 0x10d   : > { %v318_v44 = vpop.permute.xlu0 %317  ;;  %v291_v45 = vpop.permute.xlu1 %290  ;;  %v279_v61 = vsel %vm278_vm2, %v272_v43, %v277_v54 }
 0x10e   : > { %v321_v49 = vrot.slane %v318_v44, 4  ;;  %v293_v55 = vrot.slane %v291_v45, 4  ;;  %v282_v3 = vadd.f32 %v279_v61, %v267_v27  ;;  %v300_v6 = vadd.f32 %v291_v45, %v283_v2 }
 0x110   : > { %v323_v58 = vsel %vm261_vm0, %v321_v49, %v322_v53  ;;  %v360_v13 = vrot.slane %v300_v6, %v351_v4 }
 0x111   : > { %v289_v47 = vpop.permute.xlu0 %288  ;;  %v336_v52 = vpop.permute.xlu1 %335  ;;  %v324_v0 = vsel %vm278_vm2, %v318_v44, %v323_v58 }
 0x112   : > { %v292_v50 = vrot.slane %v289_v47, 4  ;;  %v338_v59 = vrot.slane %v336_v52, 4  ;;  %v327_v7 = vsub.f32 %v313_v31, %v324_v0  ;;  %v345_v12 = vadd.f32 %v336_v52, %v328_v10 }
 0x113   : > { %v375_v22 = vrot.slane %v360_v13, %v351_v4 }
 0x114   : > { %v294_v60 = vsel %vm261_vm0, %v292_v50, %v293_v55  ;;  %v407_v18 = vrot.slane %v345_v12, %v351_v4 }
 0x115   : > { %v334_v56 = vpop.permute.xlu0 %333  ;;  %v296_v1 = vsel %vm295_vm3, %v289_v47, %v294_v60 }
 0x116   : > { %v337_v57 = vrot.slane %v334_v56, 4  ;;  %v299_v9 = vadd.f32 %v296_v1, %v282_v3  ;;  %v422_v29 = vrot.slane %v407_v18, %v351_v4 }
 0x118   : > { %v339_v63 = vsel %vm261_vm0, %v337_v57, %v338_v59  ;;  %v352_v14 = vrot.slane %v299_v9, %v351_v4  ;;  %v356_v15 = vrot.slane %v299_v9, %v355_v8 }
 0x119   : > { %v341_v5 = vsel %vm340_vm4, %v334_v56, %v339_v63 }
 0x11a   : > { %v344_v11 = vadd.f32 %v341_v5, %v327_v7  ;;  %v367_v20 = vrot.slane %v352_v14, %v351_v4  ;;  %v371_v21 = vrot.slane %v356_v15, %v351_v4 }
 0x11c   : > { %v399_v17 = vrot.slane %v344_v11, %v351_v4  ;;  %v403_v19 = vrot.slane %v344_v11, %v355_v8 }
 0x11e   : > { %v414_v24 = vrot.slane %v399_v17, %v351_v4  ;;  %v418_v30 = vrot.slane %v403_v19, %v351_v4 }
 0x122   : > { %v426_v16 = vpop.permute.xlu1 %425 }
 0x123   : > { %v428_v31 = vmul.f32 %v426_v16, %v414_v24  ;;  %v429_v33 = vmul.f32 %v426_v16, %v418_v30  ;;  %v430_v34 = vmul.f32 %v426_v16, %v422_v29 }
 0x126   : > { %v379_v23 = vpop.permute.xlu0 %378  ;;  %v388_v26 = vpop.permute.xlu1 %387 }
 0x127   : > { %v381_v25 = vmul.f32 %v379_v23, %v367_v20  ;;  %v382_v27 = vmul.f32 %v379_v23, %v371_v21  ;;  %v383_v28 = vmul.f32 %v379_v23, %v375_v22 }
 0x129   : > { %v390_v32 = vadd.f32 %v388_v26, %v381_v25  ;;  %v391_v35 = vadd.f32 %v388_v26, %v382_v27  ;;  %v392_v36 = vadd.f32 %v388_v26, %v383_v28 }
 0x12a   : > { %v435_v37 = vpop.permute.xlu0 %434 }
 0x12b   : > { %v437_v38 = vadd.f32 %v435_v37, %v428_v31  ;;  %v438_v39 = vadd.f32 %v435_v37, %v429_v33  ;;  %v439_v40 = vadd.f32 %v435_v37, %v430_v34  ;;  %v440_v41 = vmul.f32 %v390_v32, %v390_v32 }
 0x12c   : > { %v441_v43 = vmul.f32 %v391_v35, %v391_v35  ;;  %v442_v44 = vmul.f32 %v392_v36, %v392_v36 }
 0x12d   : > { %v443_v42 = vmul.f32 %v437_v38, %v437_v38  ;;  %v444_v45 = vmul.f32 %v438_v39, %v438_v39  ;;  %v445_v46 = vmul.f32 %v439_v40, %v439_v40 }
 0x12f   : > { %v446_v47 = vadd.f32 %v443_v42, %v440_v41  ;;  %v447_v48 = vadd.f32 %v444_v45, %v441_v43  ;;  %v448_v49 = vadd.f32 %v445_v46, %v442_v44 }
 0x131   : > { %v449_v50 = vadd.f32 1e-06, %v446_v47  ;;  %v450_v51 = vadd.f32 1e-06, %v447_v48  ;;  %v451_v52 = vadd.f32 1e-06, %v448_v49 }
 0x133   : > { %566 = vrsqrt.f32 %v449_v50  ;;  %vm454_vm6 = vcmp.eq.f32.partialorder %v449_v50, inf  ;;  %vm456_vm7 = vcmp.eq.f32.partialorder %v449_v50, 0.0  ;;  %v457_v57 = vand.u32 2147483648, %v449_v50 }
 0x134   : > { %568 = vrsqrt.f32 %v450_v51  ;;  %vm461_vm8 = vcmp.eq.f32.partialorder %v450_v51, inf  ;;  %vm463_vm9 = vcmp.eq.f32.partialorder %v450_v51, 0.0  ;;  %v464_v60 = vand.u32 2147483648, %v450_v51 }
 0x135   : > { %570 = vrsqrt.f32 %v451_v52  ;;  %vm468_vm10 = vcmp.eq.f32.partialorder %v451_v52, inf  ;;  %v471_v0 = vand.u32 2147483648, %v451_v52  ;;  %vm470_vm11 = vcmp.eq.f32.partialorder %v451_v52, 0.0 }
 0x13d   : > { %v567_v53 = vpop.eup %566 }
 0x13e   : > { %v569_v54 = vpop.eup %568  ;;  %v453_v55 = vmul.f32 %v567_v53, %v449_v50 }
 0x13f   : > { %v571_v56 = vpop.eup %570  ;;  %v460_v58 = vmul.f32 %v569_v54, %v450_v51 }
 0x140   : > { %v455_v59 = vsel %vm454_vm6, %v449_v50, %v453_v55  ;;  %v467_v61 = vmul.f32 %v571_v56, %v451_v52 }
 0x141   : > { %v458_v62 = vsel %vm456_vm7, %v457_v57, %v455_v59  ;;  %v462_v63 = vsel %vm461_vm8, %v450_v51, %v460_v58 }
 0x142   : > { %v465_v1 = vsel %vm463_vm9, %v464_v60, %v462_v63  ;;  %v469_v2 = vsel %vm468_vm10, %v451_v52, %v467_v61 }
 0x143   : > { %v472_v3 = vsel %vm470_vm11, %v471_v0, %v469_v2  ;;  %v475_v4 = vcombine.low %v458_v62, %v465_v1 }
 0x144   : > { %479 = vst.msk [vmem:[%s224_s13 + $0x8] sm:$0xf] %vm478_vm5, %v472_v3 }
 0x145   : > { %477 = vst [vmem:[%s224_s13] sm:$0xff] %v475_v4 }
 0x146 PF: > { %s15_s18 = sadd.s32 1, %s578_s18  }
 0x147   : > { %p12_p4 = scmp.ge.s32.totalorder %s15_s18, 6  }
 0x149   :  { %14 = sbr.rel (!%p12_p4) target bundleno = 1 (0x1), region = 70 }

</bundles_post_ra>
